<compile_context>
chip_gen: v5e
topology: v5e:2x2
jax: 0.10.0
libtpu: 0.0.40
codegen_flags: <defaults>
</compile_context>

<pallas_src>
import math

import jax
import jax.numpy as jnp
from jax import lax
from jax.experimental import pallas as pl
from jax.experimental.pallas import tpu as pltpu

_LANE = 128  # lane-dense width


def _round_up(x, m):
    return ((x + m - 1) // m) * m


def _round_down(x, m):
    return (x // m) * m


# --------------------------------------------------------------------------- kernels


def _ffn_kernel(x_ref, w1_ref, b1_ref, w2_ref, b2_ref, w3_ref, b3_ref,
                wc_ref, bc_ref, wt_ref, bt_ref, out_ref):
    """One batch tile; all weights VMEM-resident."""

    def dense(h, w_ref, b_ref):
        # MXU matmul in the weight dtype, f32 accumulation, f32 bias/ReLU on the VPU
        # (v5e-safe: no bf16 VPU path required).  The cast of the streamed x tile to
        # the weight dtype happens here, per-tile, not in the wrapper.
        return jnp.dot(h.astype(w_ref.dtype), w_ref[...],
                       preferred_element_type=jnp.float32) + b_ref[...]

    h = jnp.maximum(dense(x_ref[...], w1_ref, b1_ref), 0.0)   # features: Linear+ReLU
    h = jnp.maximum(dense(h, w2_ref, b2_ref), 0.0)            # features: Linear+ReLU
    h = jnp.maximum(dense(h, w3_ref, b3_ref), 0.0)            # features: Linear+ReLU
    h = dense(h, wc_ref, bc_ref)                              # classifier (no act)
    h = jnp.maximum(h, 0.0)                                   # top_layer ReLU
    out_ref[...] = dense(h, wt_ref, bt_ref).astype(out_ref.dtype)  # top_layer Linear


def _make_ktiled_kernel(d_total, tk):
    """Fallback for large D: first layer accumulated over (tb, tk) x / (tk, 128) w1."""
    rem = d_total % tk  # static

    def kernel(x_ref, w1_ref, b1_ref, w2_ref, b2_ref, w3_ref, b3_ref,
               wc_ref, bc_ref, wt_ref, bt_ref, out_ref, acc_ref):
        k = pl.program_id(1)
        nk = pl.num_programs(1)

        @pl.when(k == 0)
        def _():
            acc_ref[...] = jnp.zeros_like(acc_ref)

        x_blk = x_ref[...]
        w1_blk = w1_ref[...]
        if rem:  # static: mask the ragged tail of the D axis on the last k step
            valid = jnp.where(k == nk - 1, rem, tk)
            col = lax.broadcasted_iota(jnp.int32, x_blk.shape, 1)
            x_blk = jnp.where(col < valid, x_blk, jnp.zeros_like(x_blk))
            row = lax.broadcasted_iota(jnp.int32, w1_blk.shape, 0)
            w1_blk = jnp.where(row < valid, w1_blk, jnp.zeros_like(w1_blk))

        acc_ref[...] += jnp.dot(x_blk.astype(w1_blk.dtype), w1_blk,
                                preferred_element_type=jnp.float32)

        @pl.when(k == nk - 1)
        def _():
            def dense(h, w_ref, b_ref):
                return jnp.dot(h.astype(w_ref.dtype), w_ref[...],
                               preferred_element_type=jnp.float32) + b_ref[...]

            h = jnp.maximum(acc_ref[...] + b1_ref[...], 0.0)
            h = jnp.maximum(dense(h, w2_ref, b2_ref), 0.0)
            h = jnp.maximum(dense(h, w3_ref, b3_ref), 0.0)
            h = dense(h, wc_ref, bc_ref)
            h = jnp.maximum(h, 0.0)
            out_ref[...] = dense(h, wt_ref, bt_ref).astype(out_ref.dtype)

    return kernel


# --------------------------------------------------------------------------- wrapper


def _pad_params(params, num_classes, compute_dtype):
    """Zero-pad layer widths to multiples of 128 lanes; cast weights to compute dtype.

    Zero padding keeps the math exact in the original columns (padded weight rows/cols
    and bias entries contribute exactly zero).  Biases stay f32: they are added after
    the f32 MXU accumulation.  Supports num_classes > 128 via n_out padding.
    """
    n_out = max(_LANE, _round_up(num_classes, _LANE))

    def pad2(a, rows, cols):
        r, c = a.shape
        return jnp.pad(a, ((0, rows - r), (0, cols - c)))

    p = {}
    p["w1"] = params["w1"].astype(compute_dtype)                     # (D, 128)
    p["w2"] = params["w2"].astype(compute_dtype)                     # (128, 128)
    p["w3"] = pad2(params["w3"], 128, _LANE).astype(compute_dtype)   # (128, 128)
    p["wc"] = pad2(params["wc"], _LANE, _LANE).astype(compute_dtype)  # (128, 128)
    p["wt"] = pad2(params["wt"], _LANE, n_out).astype(compute_dtype)  # (128, n_out)

    p["b1"] = params["b1"].astype(jnp.float32)                       # (1, 128)
    p["b2"] = params["b2"].astype(jnp.float32)
    p["b3"] = pad2(params["b3"], 1, _LANE).astype(jnp.float32)
    p["bc"] = pad2(params["bc"], 1, _LANE).astype(jnp.float32)
    p["bt"] = pad2(params["bt"], 1, n_out).astype(jnp.float32)
    return p, n_out


def _vmem_budget_bytes():
    # v7x: 64 MiB per TensorCore; v5e/v6e: 128 MiB.  Leave ~20% headroom for compiler
    # internal scratch -> ~51 MiB on v7x, ~102 MiB on v5e/v6e.
    cap = 64 * 1024 * 1024
    try:
        info = pltpu.get_tpu_info()
        cap = int(getattr(info, "vmem_capacity_bytes", cap)) or cap
    except Exception:
        pass
    return max(32 * 1024 * 1024, min(int(cap * 0.8), 112 * 1024 * 1024))


def feedforward_pallas(x_nchw, params, num_classes, *,
                       compute_dtype=jnp.float32, batch_tile=None, k_tile=None,
                       core_parallel=False):
    """x_nchw: (B, C, H, W) in any float dtype.  params: (in,out) weights, (1,out) biases."""
    B = x_nchw.shape[0]
    D = math.prod(x_nchw.shape[1:])
    x_flat = x_nchw.reshape(B, D)        # X.view(B, -1); NO dtype cast (no extra HBM copy)
    x_item = x_flat.dtype.itemsize

    # Sublane granularity only: pad the batch to the next multiple of 8 (<= 7 rows).
    # Tile-size alignment is handled by a ragged (clamped) last grid tile instead of a
    # full padded copy of x.
    Bp = _round_up(B, 8)
    if Bp != B:
        x_flat = jnp.pad(x_flat, ((0, Bp - B), (0, 0)))

    pp, n_out = _pad_params(params, num_classes, compute_dtype)
    weights = (pp["w1"], pp["b1"], pp["w2"], pp["b2"], pp["w3"], pp["b3"],
               pp["wc"], pp["bc"], pp["wt"], pp["bt"])
    weight_bytes = sum(int(a.size) * a.dtype.itemsize for a in weights)
    w1_bytes = int(pp["w1"].size) * pp["w1"].dtype.itemsize
    w_item = jnp.dtype(compute_dtype).itemsize
    out_item = jnp.dtype(compute_dtype).itemsize

    budget = _vmem_budget_bytes()
    slack = 2 * 1024 * 1024
    act_row = 8 * max(_LANE, n_out) * 4           # f32 intermediates per batch row

    # Plan A: all weights VMEM-resident (double-buffered by Pallas -> count 2x),
    # x streamed 3-deep.  tb derived so the plan actually fits the budget.
    row_a = 3 * D * x_item + 2 * n_out * out_item + act_row
    tb_a = (budget - 2 * weight_bytes - slack) // row_a
    use_ktiled = (k_tile is not None) or (tb_a < 8)

    if not use_ktiled:
        target = batch_tile if batch_tile is not None else 2048
        tb = max(8, _round_down(min(int(tb_a), int(target), Bp), 8))
        n_tiles = pl.cdiv(Bp, tb)
        grid = (n_tiles,)

        def x_spec():
            idx = lambda i: (i, 0)
            if n_tiles >= 3 and hasattr(pl, "Buffered"):
                try:
                    return pl.BlockSpec((tb, D), idx, pipeline_mode=pl.Buffered(3))
                except TypeError:
                    pass
            return pl.BlockSpec((tb, D), idx)

        in_specs = [x_spec()] + [pl.BlockSpec(a.shape, lambda i: (0, 0))
                                 for a in weights]
        out_specs = pl.BlockSpec((tb, n_out), lambda i: (i, 0))
        kernel = _ffn_kernel
        scratch_shapes = ()
        batch_sem = "parallel"
        if core_parallel and hasattr(pltpu, "CORE_PARALLEL"):
            batch_sem = pltpu.CORE_PARALLEL
        dim_sem = (batch_sem,)
    else:
        # Plan B: K-tiled first layer (large flatten dims / forced).
        tk = k_tile if k_tile is not None else 512
        tk = max(_LANE, _round_up(min(int(tk), _round_up(D, _LANE)), _LANE))
        small_w_bytes = weight_bytes - w1_bytes
        row_b = 3 * tk * x_item + 2 * n_out * out_item + _LANE * 4 + act_row
        resident_b = 2 * small_w_bytes + 2 * tk * _LANE * w_item
        tb_b = (budget - resident_b - slack) // row_b
        target = batch_tile if batch_tile is not None else 1024
        tb = max(8, _round_down(min(int(max(tb_b, 8)), int(target), Bp), 8))
        nb = pl.cdiv(Bp, tb)
        nk = pl.cdiv(D, tk)
        grid = (nb, nk)

        def x_spec():
            idx = lambda i, k: (i, k)
            if nb * nk >= 3 and hasattr(pl, "Buffered"):
                try:
                    return pl.BlockSpec((tb, tk), idx, pipeline_mode=pl.Buffered(3))
                except TypeError:
                    pass
            return pl.BlockSpec((tb, tk), idx)

        in_specs = ([x_spec(),
                     pl.BlockSpec((tk, _LANE), lambda i, k: (k, 0))]   # streamed w1
                    + [pl.BlockSpec(a.shape, lambda i, k: (0, 0))      # resident rest
                       for a in weights[1:]])
        out_specs = pl.BlockSpec((tb, n_out), lambda i, k: (i, 0))
        kernel = _make_ktiled_kernel(D, tk)
        scratch_shapes = (pltpu.VMEM((tb, _LANE), jnp.float32),)
        batch_sem = "parallel"
        if core_parallel and hasattr(pltpu, "CORE_PARALLEL"):
            batch_sem = pltpu.CORE_PARALLEL
        dim_sem = (batch_sem, "arbitrary")

    flops = 2 * B * (D * _LANE + 3 * _LANE * _LANE + _LANE * n_out)
    bytes_accessed = B * D * x_item + weight_bytes + B * n_out * out_item

    out_padded = pl.pallas_call(
        kernel,
        out_shape=jax.ShapeDtypeStruct((Bp, n_out), compute_dtype),
        grid=grid,
        in_specs=in_specs,
        out_specs=out_specs,
        scratch_shapes=scratch_shapes,
        compiler_params=pltpu.CompilerParams(
            dimension_semantics=dim_sem,
            vmem_limit_bytes=int(budget)),
        cost_estimate=pl.CostEstimate(flops=flops, transcendentals=0,
                                      bytes_accessed=bytes_accessed),
    )(x_flat, *weights)

    return out_padded[:B, :num_classes]


# ------------------------------------------------------------------- reference & init


def init_params(key, in_dim, num_classes):
    """Deterministic synthetic init. Weights stored as (in_features, out_features)."""
    dims = [(in_dim, 128), (128, 128), (128, 64), (64, 64), (64, num_classes)]
    names = ["1", "2", "3", "c", "t"]
    params = {}
    for name, (din, dout) in zip(names, dims):
        key, kw, kb = jax.random.split(key, 3)
        scale = 1.0 / jnp.sqrt(jnp.float32(din))  # mimic nn.Linear uniform bound
        params[f"w{name}"] = jax.random.uniform(kw, (din, dout), jnp.float32,
                                                minval=-scale, maxval=scale)
        params[f"b{name}"] = jax.random.uniform(kb, (1, dout), jnp.float32,
                                                minval=-scale, maxval=scale)
    return params


def feedforward_ref(x_nchw, params):
    """Pure-JAX reference of the same forward pass (correctness check)."""
    B = x_nchw.shape[0]
    h = x_nchw.reshape(B, -1)
    h = jnp.maximum(h @ params["w1"] + params["b1"], 0.0)
    h = jnp.maximum(h @ params["w2"] + params["b2"], 0.0)
    h = jnp.maximum(h @ params["w3"] + params["b3"], 0.0)
    h = h @ params["wc"] + params["bc"]
    h = jnp.maximum(h, 0.0)
    return h @ params["wt"] + params["bt"]


if __name__ == "__main__":
    key = jax.random.PRNGKey(0)
    B, C, H, W = 2, 4, 16, 16          # input_dim = (4, 16, 16) -> flattened D = 1024
    num_classes = 10

    kx, kp, kx2 = jax.random.split(key, 3)
    x = jax.random.normal(kx, (B, C, H, W), jnp.float32)
    params = init_params(kp, C * H * W, num_classes)
    ref = feedforward_ref(x, params)

    # 1) f32, resident-weights path: exact match vs JAX reference.
    out = jax.block_until_ready(feedforward_pallas(x, params, num_classes))
    assert out.shape == (B, num_classes)
    assert jnp.allclose(out, ref, atol=1e-4, rtol=1e-4), "f32 mismatch vs reference"

    # 2) bf16 compute: caller supplies bf16 activations (halves the x HBM stream);
    #    bf16 weights on the MXU, f32 accumulation + f32 bias/ReLU, bf16 writeback.
    out_bf16 = jax.block_until_ready(
        feedforward_pallas(x.astype(jnp.bfloat16), params, num_classes,
                           compute_dtype=jnp.bfloat16))
    assert out_bf16.shape == (B, num_classes)
    assert jnp.allclose(out_bf16.astype(jnp.float32), ref, atol=1e-1, rtol=1e-1), \
        "bf16 mismatch vs reference"

    # 3) forced K-tiled fallback with a ragged D tail (1024 % 384 != 0 exercises the
    #    in-kernel tail masking used for very large flatten dims).
    out_kt = jax.block_until_ready(
        feedforward_pallas(x, params, num_classes, k_tile=384))
    assert out_kt.shape == (B, num_classes)
    assert jnp.allclose(out_kt, ref, atol=1e-4, rtol=1e-4), "k-tiled mismatch vs reference"

    # 4) multi-tile batch with a ragged last tile (B=40, tb=16 -> 3 tiles, last partial;
    #    also exercises the 3-deep buffered x stream).
    B2 = 40
    x2 = jax.random.normal(kx2, (B2, C, H, W), jnp.float32)
    ref2 = feedforward_ref(x2, params)
    out2 = jax.block_until_ready(
        feedforward_pallas(x2, params, num_classes, batch_tile=16))
    assert out2.shape == (B2, num_classes)
    assert jnp.allclose(out2, ref2, atol=1e-4, rtol=1e-4), "ragged-batch mismatch vs reference"

    print("KERNEL_OK")
</pallas_src>

<mosaic_0001>
module attributes {stable_mosaic.version = 11 : i64} {
  func.func @_ffn_kernel(%arg0: i32, %arg1: memref<8x1024xf32, #tpu.memory_space<vmem>>, %arg2: memref<1024x128xf32, #tpu.memory_space<vmem>>, %arg3: memref<1x128xf32, #tpu.memory_space<vmem>>, %arg4: memref<128x128xf32, #tpu.memory_space<vmem>>, %arg5: memref<1x128xf32, #tpu.memory_space<vmem>>, %arg6: memref<128x128xf32, #tpu.memory_space<vmem>>, %arg7: memref<1x128xf32, #tpu.memory_space<vmem>>, %arg8: memref<128x128xf32, #tpu.memory_space<vmem>>, %arg9: memref<1x128xf32, #tpu.memory_space<vmem>>, %arg10: memref<128x128xf32, #tpu.memory_space<vmem>>, %arg11: memref<1x128xf32, #tpu.memory_space<vmem>>, %arg12: memref<8x128xf32, #tpu.memory_space<vmem>>) attributes {dimension_semantics = [#tpu.dimension_semantics<parallel>], iteration_bounds = array<i64: 1>, scalar_prefetch = 0 : i64, scratch_operands = 0 : i64, tpu.core_type = #tpu.core_type<tc>, window_params = [{transform_indices = @transform_0, window_bounds = array<i64: 8, 1024>}, {pipeline_mode = #tpu.pipeline_mode<synchronous>, transform_indices = @transform_1, window_bounds = array<i64: 1024, 128>}, {pipeline_mode = #tpu.pipeline_mode<synchronous>, transform_indices = @transform_2, window_bounds = array<i64: 1, 128>}, {pipeline_mode = #tpu.pipeline_mode<synchronous>, transform_indices = @transform_3, window_bounds = array<i64: 128, 128>}, {pipeline_mode = #tpu.pipeline_mode<synchronous>, transform_indices = @transform_4, window_bounds = array<i64: 1, 128>}, {pipeline_mode = #tpu.pipeline_mode<synchronous>, transform_indices = @transform_5, window_bounds = array<i64: 128, 128>}, {pipeline_mode = #tpu.pipeline_mode<synchronous>, transform_indices = @transform_6, window_bounds = array<i64: 1, 128>}, {pipeline_mode = #tpu.pipeline_mode<synchronous>, transform_indices = @transform_7, window_bounds = array<i64: 128, 128>}, {pipeline_mode = #tpu.pipeline_mode<synchronous>, transform_indices = @transform_8, window_bounds = array<i64: 1, 128>}, {pipeline_mode = #tpu.pipeline_mode<synchronous>, transform_indices = @transform_9, window_bounds = array<i64: 128, 128>}, {pipeline_mode = #tpu.pipeline_mode<synchronous>, transform_indices = @transform_10, window_bounds = array<i64: 1, 128>}, {transform_indices = @transform_11, window_bounds = array<i64: 8, 128>}]} {
    %c0 = arith.constant 0 : index
    %c0_0 = arith.constant 0 : index
    %0 = vector.load %arg1[%c0, %c0_0] : memref<8x1024xf32, #tpu.memory_space<vmem>>, vector<8x1024xf32>
    %c0_1 = arith.constant 0 : index
    %c0_2 = arith.constant 0 : index
    %1 = vector.load %arg2[%c0_1, %c0_2] : memref<1024x128xf32, #tpu.memory_space<vmem>>, vector<1024x128xf32>
    %cst = arith.constant dense<0.000000e+00> : vector<8x128xf32>
    %2 = tpu.matmul %0, %1, %cst {dimension_numbers = #tpu.dot_dimension_numbers<[1], [0], [0], [1], [0, 0, 1, 1], [], []>} : vector<8x1024xf32>, vector<1024x128xf32>, vector<8x128xf32> -> vector<8x128xf32>
    %c0_3 = arith.constant 0 : index
    %c0_4 = arith.constant 0 : index
    %3 = vector.load %arg3[%c0_3, %c0_4] : memref<1x128xf32, #tpu.memory_space<vmem>>, vector<1x128xf32>
    %4 = vector.broadcast %3 : vector<1x128xf32> to vector<8x128xf32>
    %5 = arith.addf %2, %4 : vector<8x128xf32>
    %cst_5 = arith.constant 0.000000e+00 : f32
    %6 = vector.broadcast %cst_5 : f32 to vector<8x128xf32>
    %7 = arith.maximumf %5, %6 : vector<8x128xf32>
    %c0_6 = arith.constant 0 : index
    %c0_7 = arith.constant 0 : index
    %8 = vector.load %arg4[%c0_6, %c0_7] : memref<128x128xf32, #tpu.memory_space<vmem>>, vector<128x128xf32>
    %cst_8 = arith.constant dense<0.000000e+00> : vector<8x128xf32>
    %9 = tpu.matmul %7, %8, %cst_8 {dimension_numbers = #tpu.dot_dimension_numbers<[1], [0], [0], [1], [0, 0, 1, 1], [], []>} : vector<8x128xf32>, vector<128x128xf32>, vector<8x128xf32> -> vector<8x128xf32>
    %c0_9 = arith.constant 0 : index
    %c0_10 = arith.constant 0 : index
    %10 = vector.load %arg5[%c0_9, %c0_10] : memref<1x128xf32, #tpu.memory_space<vmem>>, vector<1x128xf32>
    %11 = vector.broadcast %10 : vector<1x128xf32> to vector<8x128xf32>
    %12 = arith.addf %9, %11 : vector<8x128xf32>
    %cst_11 = arith.constant 0.000000e+00 : f32
    %13 = vector.broadcast %cst_11 : f32 to vector<8x128xf32>
    %14 = arith.maximumf %12, %13 : vector<8x128xf32>
    %c0_12 = arith.constant 0 : index
    %c0_13 = arith.constant 0 : index
    %15 = vector.load %arg6[%c0_12, %c0_13] : memref<128x128xf32, #tpu.memory_space<vmem>>, vector<128x128xf32>
    %cst_14 = arith.constant dense<0.000000e+00> : vector<8x128xf32>
    %16 = tpu.matmul %14, %15, %cst_14 {dimension_numbers = #tpu.dot_dimension_numbers<[1], [0], [0], [1], [0, 0, 1, 1], [], []>} : vector<8x128xf32>, vector<128x128xf32>, vector<8x128xf32> -> vector<8x128xf32>
    %c0_15 = arith.constant 0 : index
    %c0_16 = arith.constant 0 : index
    %17 = vector.load %arg7[%c0_15, %c0_16] : memref<1x128xf32, #tpu.memory_space<vmem>>, vector<1x128xf32>
    %18 = vector.broadcast %17 : vector<1x128xf32> to vector<8x128xf32>
    %19 = arith.addf %16, %18 : vector<8x128xf32>
    %cst_17 = arith.constant 0.000000e+00 : f32
    %20 = vector.broadcast %cst_17 : f32 to vector<8x128xf32>
    %21 = arith.maximumf %19, %20 : vector<8x128xf32>
    %c0_18 = arith.constant 0 : index
    %c0_19 = arith.constant 0 : index
    %22 = vector.load %arg8[%c0_18, %c0_19] : memref<128x128xf32, #tpu.memory_space<vmem>>, vector<128x128xf32>
    %cst_20 = arith.constant dense<0.000000e+00> : vector<8x128xf32>
    %23 = tpu.matmul %21, %22, %cst_20 {dimension_numbers = #tpu.dot_dimension_numbers<[1], [0], [0], [1], [0, 0, 1, 1], [], []>} : vector<8x128xf32>, vector<128x128xf32>, vector<8x128xf32> -> vector<8x128xf32>
    %c0_21 = arith.constant 0 : index
    %c0_22 = arith.constant 0 : index
    %24 = vector.load %arg9[%c0_21, %c0_22] : memref<1x128xf32, #tpu.memory_space<vmem>>, vector<1x128xf32>
    %25 = vector.broadcast %24 : vector<1x128xf32> to vector<8x128xf32>
    %26 = arith.addf %23, %25 : vector<8x128xf32>
    %cst_23 = arith.constant 0.000000e+00 : f32
    %27 = vector.broadcast %cst_23 : f32 to vector<8x128xf32>
    %28 = arith.maximumf %26, %27 : vector<8x128xf32>
    %c0_24 = arith.constant 0 : index
    %c0_25 = arith.constant 0 : index
    %29 = vector.load %arg10[%c0_24, %c0_25] : memref<128x128xf32, #tpu.memory_space<vmem>>, vector<128x128xf32>
    %cst_26 = arith.constant dense<0.000000e+00> : vector<8x128xf32>
    %30 = tpu.matmul %28, %29, %cst_26 {dimension_numbers = #tpu.dot_dimension_numbers<[1], [0], [0], [1], [0, 0, 1, 1], [], []>} : vector<8x128xf32>, vector<128x128xf32>, vector<8x128xf32> -> vector<8x128xf32>
    %c0_27 = arith.constant 0 : index
    %c0_28 = arith.constant 0 : index
    %31 = vector.load %arg11[%c0_27, %c0_28] : memref<1x128xf32, #tpu.memory_space<vmem>>, vector<1x128xf32>
    %32 = vector.broadcast %31 : vector<1x128xf32> to vector<8x128xf32>
    %33 = arith.addf %30, %32 : vector<8x128xf32>
    %c0_29 = arith.constant 0 : index
    %c0_30 = arith.constant 0 : index
    %34 = vector.load %arg12[%c0_29, %c0_30] : memref<8x128xf32, #tpu.memory_space<vmem>>, vector<8x128xf32>
    tpu.vector_store %arg12[%c0_29, %c0_30], %33 {strides = array<i32>} : memref<8x128xf32, #tpu.memory_space<vmem>>, vector<8x128xf32>,
    return
  }
  func.func @transform_0(%arg0: i32) -> (i32, i32) {
    %c0_i32 = arith.constant 0 : i32
    %c0_i32_0 = arith.constant 0 : i32
    return %arg0, %c0_i32 : i32, i32
  }
  func.func @transform_1(%arg0: i32) -> (i32, i32) {
    %c0_i32 = arith.constant 0 : i32
    %c0_i32_0 = arith.constant 0 : i32
    %c0_i32_1 = arith.constant 0 : i32
    return %c0_i32, %c0_i32_0 : i32, i32
  }
  func.func @transform_2(%arg0: i32) -> (i32, i32) {
    %c0_i32 = arith.constant 0 : i32
    %c0_i32_0 = arith.constant 0 : i32
    %c0_i32_1 = arith.constant 0 : i32
    return %c0_i32, %c0_i32_0 : i32, i32
  }
  func.func @transform_3(%arg0: i32) -> (i32, i32) {
    %c0_i32 = arith.constant 0 : i32
    %c0_i32_0 = arith.constant 0 : i32
    %c0_i32_1 = arith.constant 0 : i32
    return %c0_i32, %c0_i32_0 : i32, i32
  }
  func.func @transform_4(%arg0: i32) -> (i32, i32) {
    %c0_i32 = arith.constant 0 : i32
    %c0_i32_0 = arith.constant 0 : i32
    %c0_i32_1 = arith.constant 0 : i32
    return %c0_i32, %c0_i32_0 : i32, i32
  }
  func.func @transform_5(%arg0: i32) -> (i32, i32) {
    %c0_i32 = arith.constant 0 : i32
    %c0_i32_0 = arith.constant 0 : i32
    %c0_i32_1 = arith.constant 0 : i32
    return %c0_i32, %c0_i32_0 : i32, i32
  }
  func.func @transform_6(%arg0: i32) -> (i32, i32) {
    %c0_i32 = arith.constant 0 : i32
    %c0_i32_0 = arith.constant 0 : i32
    %c0_i32_1 = arith.constant 0 : i32
    return %c0_i32, %c0_i32_0 : i32, i32
  }
  func.func @transform_7(%arg0: i32) -> (i32, i32) {
    %c0_i32 = arith.constant 0 : i32
    %c0_i32_0 = arith.constant 0 : i32
    %c0_i32_1 = arith.constant 0 : i32
    return %c0_i32, %c0_i32_0 : i32, i32
  }
  func.func @transform_8(%arg0: i32) -> (i32, i32) {
    %c0_i32 = arith.constant 0 : i32
    %c0_i32_0 = arith.constant 0 : i32
    %c0_i32_1 = arith.constant 0 : i32
    return %c0_i32, %c0_i32_0 : i32, i32
  }
  func.func @transform_9(%arg0: i32) -> (i32, i32) {
    %c0_i32 = arith.constant 0 : i32
    %c0_i32_0 = arith.constant 0 : i32
    %c0_i32_1 = arith.constant 0 : i32
    return %c0_i32, %c0_i32_0 : i32, i32
  }
  func.func @transform_10(%arg0: i32) -> (i32, i32) {
    %c0_i32 = arith.constant 0 : i32
    %c0_i32_0 = arith.constant 0 : i32
    %c0_i32_1 = arith.constant 0 : i32
    return %c0_i32, %c0_i32_0 : i32, i32
  }
  func.func @transform_11(%arg0: i32) -> (i32, i32) {
    %c0_i32 = arith.constant 0 : i32
    %c0_i32_0 = arith.constant 0 : i32
    return %arg0, %c0_i32 : i32, i32
  }
}

</mosaic_0001>

<bundles_post_ra>
// kernel: tpu_custom_call.1
= control target key start
LH: loop header
LB: loop body
LE: loop exit
PB: predicated region body
PF: predicated region fallthrough
CT: control target
= control target key end

     0   :  { %16 = vsyncpa [#allocation3], 0  ;;  %s928_s0 = inlined_call_operand.hbm [shape: f32[8,1024], index: 0, kind: input, shape index: {}]   ;;  %s929_s1 = inlined_call_operand.hbm [shape: f32[1024,128], index: 1, kind: input, shape index: {}]   ;;  %s930_s2 = inlined_call_operand.vmem [shape: f32[1,128], index: 2, kind: input, shape index: {}]   ;;  %s931_s3 = inlined_call_operand.hbm [shape: f32[128,128], index: 3, kind: input, shape index: {}]   ;;  %s932_s4 = inlined_call_operand.vmem [shape: f32[1,128], index: 4, kind: input, shape index: {}]   ;;  %s933_s5 = inlined_call_operand.hbm [shape: f32[128,128], index: 5, kind: input, shape index: {}]   ;;  %s934_s6 = inlined_call_operand.vmem [shape: f32[1,128], index: 6, kind: input, shape index: {}]   ;;  %s935_s7 = inlined_call_operand.hbm [shape: f32[128,128], index: 7, kind: input, shape index: {}]   ;;  %s936_s8 = inlined_call_operand.vmem [shape: f32[1,128], index: 8, kind: input, shape index: {}]   ;;  %s937_s9 = inlined_call_operand.hbm [shape: f32[128,128], index: 9, kind: input, shape index: {}]   ;;  %s938_s10 = inlined_call_operand.vmem [shape: f32[1,128], index: 10, kind: input, shape index: {}]   ;;  %s939_s11 = inlined_call_operand.hbm [shape: f32[8,128], index: 11, kind: output, shape index: {}]  }
   0x1   :  { %17 = vsyncpa [#allocation6], 0 }
   0x2   :  { %18 = vsyncpa [#allocation9], 0 }
   0x3   :  { %19 = vsyncpa [#allocation12], 0  ;;  %s36_s19 = sshll.u32 %s929_s1, 4  ;;  %s37_s19 = int_to_ptr.hbm [resolvable:$true] %s36_s19 }
   0x4   :  { %20 = vsyncpa [#allocation4], 0  ;;  %s808_s20 = smov [#allocation5]   ;;  %s66_s24 = sshll.u32 %s933_s5, 4  ;;  %s67_s24 = int_to_ptr.hbm [resolvable:$true] %s66_s24 }
   0x5   :  { %s38_s21 = sshll.u32 %s808_s20, 4  ;;  %s809_s25 = smov 128   ;;  %s39_s21 = int_to_ptr.vmem [resolvable:$true] %s38_s21 }
   0x6   :  { %s810_s26 = smov 8   ;;  %s811_s27 = smov [#allocation8]  }
   0x7   :  { %44 = dma.hbm_to_vmem [thread:$0]  %s37_s19, 16384, %s39_s21, [#allocation6], %s809_s25, %s809_s25, %s810_s26  }
   0x8   :  { %s68_s28 = sshll.u32 %s811_s27, 4  ;;  %s26_s30 = sshll.u32 %s928_s0, 4  ;;  %s69_s28 = int_to_ptr.vmem [resolvable:$true] %s68_s28  ;;  %s27_s30 = int_to_ptr.hbm [resolvable:$true] %s26_s30 }
   0x9   :  { %74 = dma.hbm_to_vmem [thread:$0]  %s67_s24, 2048, %s69_s28, [#allocation9], %s809_s25, %s809_s25, %s810_s26  }
   0xa   :  { %s51_s13 = sshll.u32 %s931_s3, 4  ;;  %s812_s14 = smov [#allocation2]   ;;  %s52_s13 = int_to_ptr.hbm [resolvable:$true] %s51_s13 }
   0xb   :  { %s28_s15 = sshll.u32 %s812_s14, 4  ;;  %s813_s16 = smov [#allocation7]   ;;  %s29_s15 = int_to_ptr.vmem [resolvable:$true] %s28_s15 }
   0xc   :  { %31 = dma.hbm_to_vmem [thread:$0]  %s27_s30, 1024, %s29_s15, [#allocation3]  }
   0xd   :  { %s53_s17 = sshll.u32 %s813_s16, 4  ;;  %s81_s0 = sshll.u32 %s935_s7, 4  ;;  %s54_s17 = int_to_ptr.vmem [resolvable:$true] %s53_s17  ;;  %s82_s0 = int_to_ptr.hbm [resolvable:$true] %s81_s0 }
   0xe   :  { %59 = dma.hbm_to_vmem [thread:$0]  %s52_s13, 2048, %s54_s17, [#allocation6], %s809_s25, %s809_s25, %s810_s26  }
   0xf   :  { %s96_s3 = sshll.u32 %s937_s9, 4  ;;  %s814_s22 = smov [#allocation10]   ;;  %s97_s3 = int_to_ptr.hbm [resolvable:$true] %s96_s3 }
  0x10   :  { %s83_s23 = sshll.u32 %s814_s22, 4  ;;  %s815_s24 = smov [#allocation11]   ;;  %s84_s23 = int_to_ptr.vmem [resolvable:$true] %s83_s23 }
  0x11   :  { %89 = dma.hbm_to_vmem [thread:$0]  %s82_s0, 2048, %s84_s23, [#allocation9], %s809_s25, %s809_s25, %s810_s26  }
  0x12   :  { %s98_s7 = sshll.u32 %s815_s24, 4  ;;  %s99_s7 = int_to_ptr.vmem [resolvable:$true] %s98_s7 }
  0x13   :  { %104 = dma.hbm_to_vmem [thread:$0]  %s97_s3, 2048, %s99_s7, [#allocation12], %s809_s25, %s809_s25, %s810_s26  }
  0x14   :  { %798 = dma.done.wait [#allocation3], 1024  }
  0x15   :  { %799 = vsyncadd [#allocation3], 4294966272 }
  0x16   :  { %800 = dma.done.wait [#allocation6], 18432  }
  0x17   :  { %801 = vsyncadd [#allocation6], 4294948864 }
  0x18   :  { %802 = dma.done.wait [#allocation9], 4096  }
  0x19   :  { %803 = vsyncadd [#allocation9], 4294963200 }
  0x1a   :  { %804 = dma.done.wait [#allocation12], 2048  }
  0x1b   :  { %805 = vsyncadd [#allocation12], 4294965248  ;;  %v186_v0 = vld [vmem:[#allocation5 + $0x178] sm:$0xff]  ;;  %v185_v2 = vld [vmem:[#allocation5 + $0x170] sm:$0xff]  ;;  %s816_s30 = smov [#allocation13]   ;;  %s603_s14 = sshll.u32 %s939_s11, 4  ;;  %s604_s14 = int_to_ptr.hbm [resolvable:$true] %s603_s14 }
  0x1c   :  { %v154_v1 = vld [vmem:[#allocation5 + $0x78] sm:$0xff]  ;;  %311 = vmatpush.msra.mxu2 %v186_v0  ;;  %v153_v4 = vld [vmem:[#allocation5 + $0x70] sm:$0xff]  ;;  %v184_v6 = vld [vmem:[#allocation5 + $0x168] sm:$0xff]  ;;  %s601_s5 = sshll.u32 %s816_s30, 4  ;;  %s602_s5 = int_to_ptr.vmem [resolvable:$true] %s601_s5 }
  0x1d   :  { %271 = vmatpush.msra.mxu0 %v154_v1  ;;  %v202_v3 = vld [vmem:[#allocation5 + $0x1f8] sm:$0xff]  ;;  %v201_v7 = vld [vmem:[#allocation5 + $0x1f0] sm:$0xff]  ;;  %v152_v8 = vld [vmem:[#allocation5 + $0x68] sm:$0xff] }
  0x1e   :  { %v170_v5 = vld [vmem:[#allocation5 + $0xf8] sm:$0xff]  ;;  %331 = vmatpush.msra.mxu3 %v202_v3  ;;  %312 = vmatpush.msra.mxu2 %v185_v2  ;;  %v169_v9 = vld [vmem:[#allocation5 + $0xf0] sm:$0xff]  ;;  %v200_v10 = vld [vmem:[#allocation5 + $0x1e8] sm:$0xff] }
  0x1f   :  { %291 = vmatpush.msra.mxu1 %v170_v5  ;;  %272 = vmatpush.msra.mxu0 %v153_v4  ;;  %v183_v11 = vld [vmem:[#allocation5 + $0x160] sm:$0xff]  ;;  %v168_v13 = vld [vmem:[#allocation5 + $0xe8] sm:$0xff]  ;;  %v182_v16 = vld [vmem:[#allocation5 + $0x158] sm:$0xff] }
  0x20   :  { %332 = vmatpush.msra.mxu3 %v201_v7  ;;  %v151_v12 = vld [vmem:[#allocation5 + $0x60] sm:$0xff]  ;;  %313 = vmatpush.msra.mxu2 %v184_v6  ;;  %v150_v17 = vld [vmem:[#allocation5 + $0x58] sm:$0xff]  ;;  %v181_v20 = vld [vmem:[#allocation5 + $0x150] sm:$0xff] }
  0x21   :  { %292 = vmatpush.msra.mxu1 %v169_v9  ;;  %273 = vmatpush.msra.mxu0 %v152_v8  ;;  %v199_v14 = vld [vmem:[#allocation5 + $0x1e0] sm:$0xff]  ;;  %v198_v18 = vld [vmem:[#allocation5 + $0x1d8] sm:$0xff]  ;;  %v149_v21 = vld [vmem:[#allocation5 + $0x50] sm:$0xff] }
  0x22   :  { %v167_v15 = vld [vmem:[#allocation5 + $0xe0] sm:$0xff]  ;;  %333 = vmatpush.msra.mxu3 %v200_v10  ;;  %314 = vmatpush.msra.mxu2 %v183_v11  ;;  %v166_v19 = vld [vmem:[#allocation5 + $0xd8] sm:$0xff]  ;;  %v197_v22 = vld [vmem:[#allocation5 + $0x1d0] sm:$0xff] }
  0x23   :  { %293 = vmatpush.msra.mxu1 %v168_v13  ;;  %274 = vmatpush.msra.mxu0 %v151_v12  ;;  %v165_v23 = vld [vmem:[#allocation5 + $0xd0] sm:$0xff]  ;;  %v180_v24 = vld [vmem:[#allocation5 + $0x148] sm:$0xff]  ;;  %v179_v28 = vld [vmem:[#allocation5 + $0x140] sm:$0xff] }
  0x24   :  { %334 = vmatpush.msra.mxu3 %v199_v14  ;;  %315 = vmatpush.msra.mxu2 %v182_v16  ;;  %v148_v25 = vld [vmem:[#allocation5 + $0x48] sm:$0xff]  ;;  %v147_v29 = vld [vmem:[#allocation5 + $0x40] sm:$0xff]  ;;  %v178_v32 = vld [vmem:[#allocation5 + $0x138] sm:$0xff] }
  0x25   :  { %294 = vmatpush.msra.mxu1 %v167_v15  ;;  %275 = vmatpush.msra.mxu0 %v150_v17  ;;  %v196_v26 = vld [vmem:[#allocation5 + $0x1c8] sm:$0xff]  ;;  %v195_v30 = vld [vmem:[#allocation5 + $0x1c0] sm:$0xff]  ;;  %v146_v33 = vld [vmem:[#allocation5 + $0x38] sm:$0xff] }
  0x26   :  { %335 = vmatpush.msra.mxu3 %v198_v18  ;;  %316 = vmatpush.msra.mxu2 %v181_v20  ;;  %v164_v27 = vld [vmem:[#allocation5 + $0xc8] sm:$0xff]  ;;  %v163_v31 = vld [vmem:[#allocation5 + $0xc0] sm:$0xff]  ;;  %v194_v34 = vld [vmem:[#allocation5 + $0x1b8] sm:$0xff] }
  0x27   :  { %295 = vmatpush.msra.mxu1 %v166_v19  ;;  %276 = vmatpush.msra.mxu0 %v149_v21  ;;  %v162_v35 = vld [vmem:[#allocation5 + $0xb8] sm:$0xff]  ;;  %v177_v36 = vld [vmem:[#allocation5 + $0x130] sm:$0xff]  ;;  %v176_v40 = vld [vmem:[#allocation5 + $0x128] sm:$0xff] }
  0x28   :  { %336 = vmatpush.msra.mxu3 %v197_v22  ;;  %317 = vmatpush.msra.mxu2 %v180_v24  ;;  %v145_v37 = vld [vmem:[#allocation5 + $0x30] sm:$0xff]  ;;  %v144_v41 = vld [vmem:[#allocation5 + $0x28] sm:$0xff]  ;;  %v175_v44 = vld [vmem:[#allocation5 + $0x120] sm:$0xff] }
  0x29   :  { %296 = vmatpush.msra.mxu1 %v165_v23  ;;  %277 = vmatpush.msra.mxu0 %v148_v25  ;;  %v193_v38 = vld [vmem:[#allocation5 + $0x1b0] sm:$0xff]  ;;  %v192_v42 = vld [vmem:[#allocation5 + $0x1a8] sm:$0xff]  ;;  %v143_v45 = vld [vmem:[#allocation5 + $0x20] sm:$0xff] }
  0x2a   :  { %337 = vmatpush.msra.mxu3 %v196_v26  ;;  %318 = vmatpush.msra.mxu2 %v179_v28  ;;  %v161_v39 = vld [vmem:[#allocation5 + $0xb0] sm:$0xff]  ;;  %v160_v43 = vld [vmem:[#allocation5 + $0xa8] sm:$0xff]  ;;  %v191_v46 = vld [vmem:[#allocation5 + $0x1a0] sm:$0xff] }
  0x2b   :  { %297 = vmatpush.msra.mxu1 %v164_v27  ;;  %278 = vmatpush.msra.mxu0 %v147_v29  ;;  %v159_v47 = vld [vmem:[#allocation5 + $0xa0] sm:$0xff]  ;;  %v174_v48 = vld [vmem:[#allocation5 + $0x118] sm:$0xff]  ;;  %v173_v52 = vld [vmem:[#allocation5 + $0x110] sm:$0xff] }
  0x2c   :  { %338 = vmatpush.msra.mxu3 %v195_v30  ;;  %319 = vmatpush.msra.mxu2 %v178_v32  ;;  %v142_v49 = vld [vmem:[#allocation5 + $0x18] sm:$0xff]  ;;  %v141_v53 = vld [vmem:[#allocation5 + $0x10] sm:$0xff]  ;;  %v172_v56 = vld [vmem:[#allocation5 + $0x108] sm:$0xff] }
  0x2d   :  { %298 = vmatpush.msra.mxu1 %v163_v31  ;;  %279 = vmatpush.msra.mxu0 %v146_v33  ;;  %v190_v50 = vld [vmem:[#allocation5 + $0x198] sm:$0xff]  ;;  %v189_v54 = vld [vmem:[#allocation5 + $0x190] sm:$0xff]  ;;  %v140_v57 = vld [vmem:[#allocation5 + $0x8] sm:$0xff] }
  0x2e   :  { %339 = vmatpush.msra.mxu3 %v194_v34  ;;  %320 = vmatpush.msra.mxu2 %v177_v36  ;;  %v158_v51 = vld [vmem:[#allocation5 + $0x98] sm:$0xff]  ;;  %v157_v55 = vld [vmem:[#allocation5 + $0x90] sm:$0xff]  ;;  %v188_v58 = vld [vmem:[#allocation5 + $0x188] sm:$0xff] }
  0x2f   :  { %299 = vmatpush.msra.mxu1 %v162_v35  ;;  %280 = vmatpush.msra.mxu0 %v145_v37  ;;  %v156_v59 = vld [vmem:[#allocation5 + $0x88] sm:$0xff]  ;;  %v171_v60 = vld [vmem:[#allocation5 + $0x100] sm:$0xff]  ;;  %v250_v62 = vld [vmem:[#allocation5 + $0x378] sm:$0xff] }
  0x30   :  { %340 = vmatpush.msra.mxu3 %v193_v38  ;;  %321 = vmatpush.msra.mxu2 %v176_v40  ;;  %v139_v61 = vld [vmem:[#allocation5] sm:$0xff]  ;;  %v218_v0 = vld [vmem:[#allocation5 + $0x278] sm:$0xff]  ;;  %v249_v2 = vld [vmem:[#allocation5 + $0x370] sm:$0xff] }
  0x31   :  { %300 = vmatpush.msra.mxu1 %v161_v39  ;;  %281 = vmatpush.msra.mxu0 %v144_v41  ;;  %v187_v63 = vld [vmem:[#allocation5 + $0x180] sm:$0xff]  ;;  %v266_v1 = vld [vmem:[#allocation5 + $0x3f8] sm:$0xff]  ;;  %v217_v4 = vld [vmem:[#allocation5 + $0x270] sm:$0xff] }
  0x32   :  { %341 = vmatpush.msra.mxu3 %v192_v42  ;;  %322 = vmatpush.msra.mxu2 %v175_v44  ;;  %v155_v3 = vld [vmem:[#allocation5 + $0x80] sm:$0xff]  ;;  %v234_v5 = vld [vmem:[#allocation5 + $0x2f8] sm:$0xff]  ;;  %v248_v6 = vld [vmem:[#allocation5 + $0x368] sm:$0xff] }
  0x33   :  { %301 = vmatpush.msra.mxu1 %v160_v43  ;;  %282 = vmatpush.msra.mxu0 %v143_v45  ;;  %v265_v7 = vld [vmem:[#allocation5 + $0x3f0] sm:$0xff]  ;;  %v216_v8 = vld [vmem:[#allocation5 + $0x268] sm:$0xff]  ;;  %v247_v10 = vld [vmem:[#allocation5 + $0x360] sm:$0xff] }
  0x34   :  { %342 = vmatpush.msra.mxu3 %v191_v46  ;;  %323 = vmatpush.msra.mxu2 %v174_v48  ;;  %v233_v9 = vld [vmem:[#allocation5 + $0x2f0] sm:$0xff]  ;;  %v264_v11 = vld [vmem:[#allocation5 + $0x3e8] sm:$0xff]  ;;  %v215_v12 = vld [vmem:[#allocation5 + $0x260] sm:$0xff] }
  0x35   :  { %302 = vmatpush.msra.mxu1 %v159_v47  ;;  %283 = vmatpush.msra.mxu0 %v142_v49  ;;  %v232_v13 = vld [vmem:[#allocation5 + $0x2e8] sm:$0xff]  ;;  %v246_v14 = vld [vmem:[#allocation5 + $0x358] sm:$0xff]  ;;  %v263_v15 = vld [vmem:[#allocation5 + $0x3e0] sm:$0xff] }
  0x36   :  { %343 = vmatpush.msra.mxu3 %v190_v50  ;;  %324 = vmatpush.msra.mxu2 %v173_v52  ;;  %v214_v16 = vld [vmem:[#allocation5 + $0x258] sm:$0xff]  ;;  %v231_v17 = vld [vmem:[#allocation5 + $0x2e0] sm:$0xff]  ;;  %v245_v18 = vld [vmem:[#allocation5 + $0x350] sm:$0xff] }
  0x37   :  { %303 = vmatpush.msra.mxu1 %v158_v51  ;;  %284 = vmatpush.msra.mxu0 %v141_v53  ;;  %v262_v19 = vld [vmem:[#allocation5 + $0x3d8] sm:$0xff]  ;;  %v213_v20 = vld [vmem:[#allocation5 + $0x250] sm:$0xff]  ;;  %v244_v22 = vld [vmem:[#allocation5 + $0x348] sm:$0xff] }
  0x38   :  { %344 = vmatpush.msra.mxu3 %v189_v54  ;;  %325 = vmatpush.msra.mxu2 %v172_v56  ;;  %v230_v21 = vld [vmem:[#allocation5 + $0x2d8] sm:$0xff]  ;;  %v261_v23 = vld [vmem:[#allocation5 + $0x3d0] sm:$0xff]  ;;  %v212_v24 = vld [vmem:[#allocation5 + $0x248] sm:$0xff] }
  0x39   :  { %304 = vmatpush.msra.mxu1 %v157_v55  ;;  %285 = vmatpush.msra.mxu0 %v140_v57  ;;  %v229_v25 = vld [vmem:[#allocation5 + $0x2d0] sm:$0xff]  ;;  %v243_v26 = vld [vmem:[#allocation5 + $0x340] sm:$0xff]  ;;  %v260_v27 = vld [vmem:[#allocation5 + $0x3c8] sm:$0xff] }
  0x3a   :  { %345 = vmatpush.msra.mxu3 %v188_v58  ;;  %326 = vmatpush.msra.mxu2 %v171_v60  ;;  %v211_v28 = vld [vmem:[#allocation5 + $0x240] sm:$0xff]  ;;  %v228_v29 = vld [vmem:[#allocation5 + $0x2c8] sm:$0xff]  ;;  %v242_v30 = vld [vmem:[#allocation5 + $0x338] sm:$0xff] }
  0x3b   :  { %305 = vmatpush.msra.mxu1 %v156_v59  ;;  %286 = vmatpush.msra.mxu0 %v139_v61  ;;  %v259_v31 = vld [vmem:[#allocation5 + $0x3c0] sm:$0xff]  ;;  %v210_v32 = vld [vmem:[#allocation5 + $0x238] sm:$0xff]  ;;  %v241_v34 = vld [vmem:[#allocation5 + $0x330] sm:$0xff] }
  0x3c   :  { %391 = vmatpush.msrb.mxu2 %v250_v62  ;;  %346 = vmatpush.msra.mxu3 %v187_v63  ;;  %v227_v33 = vld [vmem:[#allocation5 + $0x2c0] sm:$0xff]  ;;  %v258_v35 = vld [vmem:[#allocation5 + $0x3b8] sm:$0xff]  ;;  %v209_v36 = vld [vmem:[#allocation5 + $0x230] sm:$0xff] }
  0x3d   :  { %351 = vmatpush.msrb.mxu0 %v218_v0  ;;  %306 = vmatpush.msra.mxu1 %v155_v3  ;;  %v226_v37 = vld [vmem:[#allocation5 + $0x2b8] sm:$0xff]  ;;  %v240_v38 = vld [vmem:[#allocation5 + $0x328] sm:$0xff]  ;;  %v257_v39 = vld [vmem:[#allocation5 + $0x3b0] sm:$0xff] }
  0x3e   :  { %411 = vmatpush.msrb.mxu3 %v266_v1  ;;  %392 = vmatpush.msrb.mxu2 %v249_v2  ;;  %v208_v40 = vld [vmem:[#allocation5 + $0x228] sm:$0xff]  ;;  %v225_v41 = vld [vmem:[#allocation5 + $0x2b0] sm:$0xff]  ;;  %v239_v42 = vld [vmem:[#allocation5 + $0x320] sm:$0xff] }
  0x3f   :  { %352 = vmatpush.msrb.mxu0 %v217_v4  ;;  %371 = vmatpush.msrb.mxu1 %v234_v5  ;;  %v256_v43 = vld [vmem:[#allocation5 + $0x3a8] sm:$0xff]  ;;  %v133_v44 = vld [vmem:[#allocation2 + $0x10] sm:$0xff]  ;;  %v207_v45 = vld [vmem:[#allocation5 + $0x220] sm:$0xff] }
  0x40   :  { %393 = vmatpush.msrb.mxu2 %v248_v6  ;;  %412 = vmatpush.msrb.mxu3 %v265_v7  ;;  %v224_v46 = vld [vmem:[#allocation5 + $0x2a8] sm:$0xff]  ;;  %v238_v47 = vld [vmem:[#allocation5 + $0x318] sm:$0xff]  ;;  %v255_v48 = vld [vmem:[#allocation5 + $0x3a0] sm:$0xff] }
  0x41   :  { %353 = vmatpush.msrb.mxu0 %v216_v8  ;;  %372 = vmatpush.msrb.mxu1 %v233_v9  ;;  %v131_v49 = vld [vmem:[#allocation2] sm:$0xff]  ;;  %v134_v50 = vld [vmem:[#allocation2 + $0x18] sm:$0xff]  ;;  %v237_v53 = vld [vmem:[#allocation5 + $0x310] sm:$0xff] }
  0x42   :  { %394 = vmatpush.msrb.mxu2 %v247_v10  ;;  %413 = vmatpush.msrb.mxu3 %v264_v11  ;;  %v206_v51 = vld [vmem:[#allocation5 + $0x218] sm:$0xff]  ;;  %v223_v52 = vld [vmem:[#allocation5 + $0x2a0] sm:$0xff]  ;;  %v132_v55 = vld [vmem:[#allocation2 + $0x8] sm:$0xff] }
  0x43   :  { %354 = vmatpush.msrb.mxu0 %v215_v12  ;;  %373 = vmatpush.msrb.mxu1 %v232_v13  ;;  %v254_v54 = vld [vmem:[#allocation5 + $0x398] sm:$0xff]  ;;  %v205_v56 = vld [vmem:[#allocation5 + $0x210] sm:$0xff]  ;;  %v236_v58 = vld [vmem:[#allocation5 + $0x308] sm:$0xff] }
  0x44   :  { %395 = vmatpush.msrb.mxu2 %v246_v14  ;;  %414 = vmatpush.msrb.mxu3 %v263_v15  ;;  %v222_v57 = vld [vmem:[#allocation5 + $0x298] sm:$0xff]  ;;  %v253_v59 = vld [vmem:[#allocation5 + $0x390] sm:$0xff]  ;;  %v204_v60 = vld [vmem:[#allocation5 + $0x208] sm:$0xff] }
  0x45   :  { %355 = vmatpush.msrb.mxu0 %v214_v16  ;;  %374 = vmatpush.msrb.mxu1 %v231_v17  ;;  %v221_v61 = vld [vmem:[#allocation5 + $0x290] sm:$0xff]  ;;  %v235_v62 = vld [vmem:[#allocation5 + $0x300] sm:$0xff]  ;;  %v252_v63 = vld [vmem:[#allocation5 + $0x388] sm:$0xff] }
  0x46   :  { %396 = vmatpush.msrb.mxu2 %v245_v18  ;;  %415 = vmatpush.msrb.mxu3 %v262_v19  ;;  %v137_v0 = vld [vmem:[#allocation2 + $0x30] sm:$0xff]  ;;  %v203_v1 = vld [vmem:[#allocation5 + $0x200] sm:$0xff]  ;;  %v220_v2 = vld [vmem:[#allocation5 + $0x288] sm:$0xff] }
  0x47   :  { %356 = vmatpush.msrb.mxu0 %v213_v20  ;;  %375 = vmatpush.msrb.mxu1 %v230_v21  ;;  %v251_v3 = vld [vmem:[#allocation5 + $0x380] sm:$0xff]  ;;  %v138_v5 = vld [vmem:[#allocation2 + $0x38] sm:$0xff]  ;;  %v136_v8 = vld [vmem:[#allocation2 + $0x28] sm:$0xff] }
  0x48   :  { %397 = vmatpush.msrb.mxu2 %v244_v22  ;;  %416 = vmatpush.msrb.mxu3 %v261_v23  ;;  %v135_v4 = vld [vmem:[#allocation2 + $0x20] sm:$0xff]  ;;  %v447_v7 = vld [vmem:[#allocation7 + $0x78] sm:$0xff]  ;;  %v446_v9 = vld [vmem:[#allocation7 + $0x70] sm:$0xff] }
  0x49   :  { %357 = vmatpush.msrb.mxu0 %v212_v24  ;;  %376 = vmatpush.msrb.mxu1 %v229_v25  ;;  %v219_v6 = vld [vmem:[#allocation5 + $0x280] sm:$0xff]  ;;  %v445_v10 = vld [vmem:[#allocation7 + $0x68] sm:$0xff]  ;;  %v443_v12 = vld [vmem:[#allocation7 + $0x58] sm:$0xff] }
  0x4a   :  { %398 = vmatpush.msrb.mxu2 %v243_v26  ;;  %417 = vmatpush.msrb.mxu3 %v260_v27  ;;  %v444_v11 = vld [vmem:[#allocation7 + $0x60] sm:$0xff]  ;;  %v442_v13 = vld [vmem:[#allocation7 + $0x50] sm:$0xff]  ;;  %v441_v14 = vld [vmem:[#allocation7 + $0x48] sm:$0xff] }
  0x4b   :  { %358 = vmatpush.msrb.mxu0 %v211_v28  ;;  %377 = vmatpush.msrb.mxu1 %v228_v29  ;;  %v440_v15 = vld [vmem:[#allocation7 + $0x40] sm:$0xff]  ;;  %v439_v16 = vld [vmem:[#allocation7 + $0x38] sm:$0xff]  ;;  %v438_v17 = vld [vmem:[#allocation7 + $0x30] sm:$0xff] }
  0x4c   :  { %399 = vmatpush.msrb.mxu2 %v242_v30  ;;  %418 = vmatpush.msrb.mxu3 %v259_v31  ;;  %v437_v18 = vld [vmem:[#allocation7 + $0x28] sm:$0xff]  ;;  %v436_v19 = vld [vmem:[#allocation7 + $0x20] sm:$0xff]  ;;  %v435_v20 = vld [vmem:[#allocation7 + $0x18] sm:$0xff] }
  0x4d   :  { %359 = vmatpush.msrb.mxu0 %v210_v32  ;;  %378 = vmatpush.msrb.mxu1 %v227_v33  ;;  %v434_v21 = vld [vmem:[#allocation7 + $0x10] sm:$0xff]  ;;  %v433_v22 = vld [vmem:[#allocation7 + $0x8] sm:$0xff]  ;;  %v432_v23 = vld [vmem:[#allocation7] sm:$0xff] }
  0x4e   :  { %400 = vmatpush.msrb.mxu2 %v241_v34  ;;  %419 = vmatpush.msrb.mxu3 %v258_v35  ;;  %v488_v24 = vld [vmem:[#allocation8 + $0x78] sm:$0xff]  ;;  %v487_v25 = vld [vmem:[#allocation8 + $0x70] sm:$0xff]  ;;  %v486_v26 = vld [vmem:[#allocation8 + $0x68] sm:$0xff] }
  0x4f   :  { %360 = vmatpush.msrb.mxu0 %v209_v36  ;;  %379 = vmatpush.msrb.mxu1 %v226_v37  ;;  %v485_v27 = vld [vmem:[#allocation8 + $0x60] sm:$0xff]  ;;  %v484_v28 = vld [vmem:[#allocation8 + $0x58] sm:$0xff]  ;;  %v483_v30 = vld [vmem:[#allocation8 + $0x50] sm:$0xff] }
  0x50   :  { %401 = vmatpush.msrb.mxu2 %v240_v38  ;;  %420 = vmatpush.msrb.mxu3 %v257_v39  ;;  %v625_v29 = vld [vmem:[%s930_s2] ss:$0 sm:$0xff]  ;;  %v482_v31 = vld [vmem:[#allocation8 + $0x48] sm:$0xff]  ;;  %v480_v36 = vld [vmem:[#allocation8 + $0x38] sm:$0xff] }
  0x51   :  { %361 = vmatpush.msrb.mxu0 %v208_v40  ;;  %380 = vmatpush.msrb.mxu1 %v225_v41  ;;  %v481_v34 = vld [vmem:[#allocation8 + $0x40] sm:$0xff]  ;;  %v479_v39 = vld [vmem:[#allocation8 + $0x30] sm:$0xff] }
  0x52   :  { %402 = vmatpush.msrb.mxu2 %v239_v42  ;;  %421 = vmatpush.msrb.mxu3 %v256_v43  ;;  %v478_v42 = vld [vmem:[#allocation8 + $0x28] sm:$0xff] }
  0x53   :  { %327 = vmatmul.f32.vlgmr.msra.gmra.mxu2 %v133_v44  ;;  %362 = vmatpush.msrb.mxu0 %v207_v45  ;;  %v477_v44 = vld [vmem:[#allocation8 + $0x20] sm:$0xff] }
  0x54   :  { %381 = vmatpush.msrb.mxu1 %v224_v46  ;;  %403 = vmatpush.msrb.mxu2 %v238_v47  ;;  %v476_v47 = vld [vmem:[#allocation8 + $0x18] sm:$0xff] }
  0x55   :  { %422 = vmatpush.msrb.mxu3 %v255_v48  ;;  %287 = vmatmul.f32.vlgmr.msra.gmra.mxu0 %v131_v49 }
  0x56   :  { %347 = vmatmul.f32.vlgmr.msra.gmra.mxu3 %v134_v50  ;;  %363 = vmatpush.msrb.mxu0 %v206_v51 }
  0x57   :  { %382 = vmatpush.msrb.mxu1 %v223_v52  ;;  %404 = vmatpush.msrb.mxu2 %v237_v53 }
  0x58   :  { %423 = vmatpush.msrb.mxu3 %v254_v54  ;;  %307 = vmatmul.f32.vlgmr.msra.gmra.mxu1 %v132_v55  ;;  %v475_v55 = vld [vmem:[#allocation8 + $0x10] sm:$0xff] }
  0x59   :  { %364 = vmatpush.msrb.mxu0 %v205_v56  ;;  %383 = vmatpush.msrb.mxu1 %v222_v57  ;;  %v474_v56 = vld [vmem:[#allocation8 + $0x8] sm:$0xff]  ;;  %v473_v57 = vld [vmem:[#allocation8] sm:$0xff] }
  0x5a   :  { %405 = vmatpush.msrb.mxu2 %v236_v58  ;;  %424 = vmatpush.msrb.mxu3 %v253_v59  ;;  %v529_v58 = vld [vmem:[#allocation10 + $0x78] sm:$0xff]  ;;  %v528_v59 = vld [vmem:[#allocation10 + $0x70] sm:$0xff] }
  0x5b   :  { %365 = vmatpush.msrb.mxu0 %v204_v60  ;;  %384 = vmatpush.msrb.mxu1 %v221_v61  ;;  %v527_v60 = vld [vmem:[#allocation10 + $0x68] sm:$0xff]  ;;  %v526_v61 = vld [vmem:[#allocation10 + $0x60] sm:$0xff] }
  0x5c   :  { %406 = vmatpush.msrb.mxu2 %v235_v62  ;;  %425 = vmatpush.msrb.mxu3 %v252_v63  ;;  %v525_v62 = vld [vmem:[#allocation10 + $0x58] sm:$0xff]  ;;  %v524_v63 = vld [vmem:[#allocation10 + $0x50] sm:$0xff] }
  0x5d   :  { %407 = vmatmul.f32.vlgmr.msrb.gmra.mxu2 %v137_v0  ;;  %366 = vmatpush.msrb.mxu0 %v203_v1  ;;  %v523_v0 = vld [vmem:[#allocation10 + $0x48] sm:$0xff]  ;;  %v522_v1 = vld [vmem:[#allocation10 + $0x40] sm:$0xff] }
  0x5e   :  { %385 = vmatpush.msrb.mxu1 %v220_v2  ;;  %426 = vmatpush.msrb.mxu3 %v251_v3  ;;  %v521_v2 = vld [vmem:[#allocation10 + $0x38] sm:$0xff]  ;;  %v520_v3 = vld [vmem:[#allocation10 + $0x30] sm:$0xff] }
  0x5f   :  { %367 = vmatmul.f32.vlgmr.msrb.gmra.mxu0 %v135_v4  ;;  %427 = vmatmul.f32.vlgmr.msrb.gmra.mxu3 %v138_v5  ;;  %v519_v4 = vld [vmem:[#allocation10 + $0x28] sm:$0xff]  ;;  %v518_v5 = vld [vmem:[#allocation10 + $0x20] sm:$0xff] }
  0x60   :  { %386 = vmatpush.msrb.mxu1 %v219_v6  ;;  %452 = vmatpush.msra.mxu0 %v447_v7  ;;  %v517_v6 = vld [vmem:[#allocation10 + $0x18] sm:$0xff]  ;;  %v626_v7 = vld [vmem:[%s932_s4] ss:$0 sm:$0xff] }
  0x61   :  { %387 = vmatmul.f32.vlgmr.msrb.gmra.mxu1 %v136_v8  ;;  %534 = vmatpush.msra.mxu2 %v529_v58 }
  0x62   :  { %453 = vmatpush.msra.mxu0 %v446_v9  ;;  %493 = vmatpush.msra.mxu1 %v488_v24  ;;  %v560_v24 = vld [vmem:[#allocation11 + $0x28] sm:$0xff] }
  0x63   :  { %535 = vmatpush.msra.mxu2 %v528_v59 }
  0x64   :  { %454 = vmatpush.msra.mxu0 %v445_v10  ;;  %494 = vmatpush.msra.mxu1 %v487_v25  ;;  %v559_v25 = vld [vmem:[#allocation11 + $0x20] sm:$0xff] }
  0x65   :  { %536 = vmatpush.msra.mxu2 %v527_v60 }
  0x66   :  { %455 = vmatpush.msra.mxu0 %v444_v11  ;;  %495 = vmatpush.msra.mxu1 %v486_v26  ;;  %v516_v11 = vld [vmem:[#allocation10 + $0x10] sm:$0xff]  ;;  %v558_v26 = vld [vmem:[#allocation11 + $0x18] sm:$0xff] }
  0x67   :  { %537 = vmatpush.msra.mxu2 %v526_v61 }
  0x68   :  { %456 = vmatpush.msra.mxu0 %v443_v12  ;;  %496 = vmatpush.msra.mxu1 %v485_v27  ;;  %v515_v12 = vld [vmem:[#allocation10 + $0x8] sm:$0xff]  ;;  %v627_v27 = vld [vmem:[%s934_s6] ss:$0 sm:$0xff] }
  0x69   :  { %538 = vmatpush.msra.mxu2 %v525_v62 }
  0x6a   :  { %457 = vmatpush.msra.mxu0 %v442_v13  ;;  %497 = vmatpush.msra.mxu1 %v484_v28  ;;  %v514_v13 = vld [vmem:[#allocation10] sm:$0xff] }
  0x6b   :  { %539 = vmatpush.msra.mxu2 %v524_v63 }
  0x6c   :  { %458 = vmatpush.msra.mxu0 %v441_v14  ;;  %498 = vmatpush.msra.mxu1 %v483_v30  ;;  %v570_v14 = vld [vmem:[#allocation11 + $0x78] sm:$0xff] }
  0x6d   :  { %540 = vmatpush.msra.mxu2 %v523_v0  ;;  %575 = vmatpush.msra.mxu3 %v570_v14 }
  0x6e   :  { %459 = vmatpush.msra.mxu0 %v440_v15  ;;  %499 = vmatpush.msra.mxu1 %v482_v31  ;;  %v569_v15 = vld [vmem:[#allocation11 + $0x70] sm:$0xff] }
  0x6f   :  { %541 = vmatpush.msra.mxu2 %v522_v1  ;;  %576 = vmatpush.msra.mxu3 %v569_v15  ;;  %v557_v31 = vld [vmem:[#allocation11 + $0x10] sm:$0xff] }
  0x70   :  { %460 = vmatpush.msra.mxu0 %v439_v16  ;;  %500 = vmatpush.msra.mxu1 %v481_v34  ;;  %v568_v16 = vld [vmem:[#allocation11 + $0x68] sm:$0xff]  ;;  %v628_v34 = vld [vmem:[%s936_s8] ss:$0 sm:$0xff] }
  0x71   :  { %542 = vmatpush.msra.mxu2 %v521_v2  ;;  %577 = vmatpush.msra.mxu3 %v568_v16 }
  0x72   :  { %461 = vmatpush.msra.mxu0 %v438_v17  ;;  %501 = vmatpush.msra.mxu1 %v480_v36  ;;  %v567_v17 = vld [vmem:[#allocation11 + $0x60] sm:$0xff] }
  0x73   :  { %543 = vmatpush.msra.mxu2 %v520_v3  ;;  %578 = vmatpush.msra.mxu3 %v567_v17 }
  0x74   :  { %462 = vmatpush.msra.mxu0 %v437_v18  ;;  %502 = vmatpush.msra.mxu1 %v479_v39  ;;  %v566_v18 = vld [vmem:[#allocation11 + $0x58] sm:$0xff] }
  0x75   :  { %544 = vmatpush.msra.mxu2 %v519_v4  ;;  %579 = vmatpush.msra.mxu3 %v566_v18 }
  0x76   :  { %463 = vmatpush.msra.mxu0 %v436_v19  ;;  %503 = vmatpush.msra.mxu1 %v478_v42  ;;  %v565_v19 = vld [vmem:[#allocation11 + $0x50] sm:$0xff] }
  0x77   :  { %545 = vmatpush.msra.mxu2 %v518_v5  ;;  %580 = vmatpush.msra.mxu3 %v565_v19 }
  0x78   :  { %464 = vmatpush.msra.mxu0 %v435_v20  ;;  %504 = vmatpush.msra.mxu1 %v477_v44  ;;  %v564_v20 = vld [vmem:[#allocation11 + $0x48] sm:$0xff] }
  0x79   :  { %546 = vmatpush.msra.mxu2 %v517_v6  ;;  %581 = vmatpush.msra.mxu3 %v564_v20 }
  0x7a   :  { %465 = vmatpush.msra.mxu0 %v434_v21  ;;  %505 = vmatpush.msra.mxu1 %v476_v47  ;;  %v563_v21 = vld [vmem:[#allocation11 + $0x40] sm:$0xff] }
  0x7b   :  { %547 = vmatpush.msra.mxu2 %v516_v11  ;;  %582 = vmatpush.msra.mxu3 %v563_v21 }
  0x7c   :  { %466 = vmatpush.msra.mxu0 %v433_v22  ;;  %506 = vmatpush.msra.mxu1 %v475_v55  ;;  %v562_v22 = vld [vmem:[#allocation11 + $0x38] sm:$0xff] }
  0x7d   :  { %548 = vmatpush.msra.mxu2 %v515_v12  ;;  %583 = vmatpush.msra.mxu3 %v562_v22 }
  0x7e   :  { %467 = vmatpush.msra.mxu0 %v432_v23  ;;  %507 = vmatpush.msra.mxu1 %v474_v56  ;;  %v561_v23 = vld [vmem:[#allocation11 + $0x30] sm:$0xff] }
  0x7f   :  { %549 = vmatpush.msra.mxu2 %v514_v13  ;;  %584 = vmatpush.msra.mxu3 %v561_v23 }
  0x80   :  { %508 = vmatpush.msra.mxu1 %v473_v57 }
  0x81   :  { %585 = vmatpush.msra.mxu3 %v560_v24 }
  0x83   :  { %586 = vmatpush.msra.mxu3 %v559_v25 }
  0x85   :  { %587 = vmatpush.msra.mxu3 %v558_v26 }
  0x87   :  { %588 = vmatpush.msra.mxu3 %v557_v31 }
  0xd2   :  { %v288_v32 = vpop.f32.mrf.mxu0 }
  0xd3   :  { %v289_v33 = vadd.f32 %v625_v29, %v288_v32  ;;  %v556_v32 = vld [vmem:[#allocation11 + $0x8] sm:$0xff] }
  0xd4   :  { %589 = vmatpush.msra.mxu3 %v556_v32 }
  0xd5   :  { %v308_v35 = vpop.f32.mrf.mxu1 }
  0xd6   :  { %v309_v37 = vadd.f32 %v308_v35, %v289_v33  ;;  %v328_v38 = vpop.f32.mrf.mxu2  ;;  %v555_v33 = vld [vmem:[#allocation11] sm:$0xff] }
  0xd7   :  { %590 = vmatpush.msra.mxu3 %v555_v33 }
  0xd8   :  { %v329_v40 = vadd.f32 %v328_v38, %v309_v37  ;;  %v629_v38 = vld [vmem:[%s938_s10] ss:$0 sm:$0xff] }
  0xd9   :  { %v348_v41 = vpop.f32.mrf.mxu3 }
  0xda   :  { %v349_v43 = vadd.f32 %v348_v41, %v329_v40 }
  0xdc   :  { %v368_v45 = vpop.f32.mrf.mxu0 }
  0xdd   :  { %v369_v46 = vadd.f32 %v368_v45, %v349_v43 }
  0xde   :  { %v388_v48 = vpop.f32.mrf.mxu1 }
  0xdf   :  { %v389_v49 = vadd.f32 %v388_v48, %v369_v46 }
  0xe0   :  { %v408_v50 = vpop.f32.mrf.mxu2 }
  0xe1   :  { %v409_v51 = vadd.f32 %v408_v50, %v389_v49 }
  0xe2   :  { %v428_v52 = vpop.f32.mrf.mxu3 }
  0xe3   :  { %v429_v53 = vadd.f32 %v428_v52, %v409_v51 }
  0xe5   :  { %v431_v54 = vmax.f32 %v429_v53, 0.0 }
  0xe7   :  { %468 = vmatmul.f32.vlgmr.msra.gmra.mxu0 %v431_v54 }
 0x164   :  { %v469_v8 = vpop.f32.mrf.mxu0 }
 0x165   :  { %v470_v9 = vadd.f32 %v626_v7, %v469_v8 }
 0x167   :  { %v472_v10 = vmax.f32 %v470_v9, 0.0 }
 0x169   :  { %509 = vmatmul.f32.vlgmr.msra.gmra.mxu1 %v472_v10 }
 0x1e6   :  { %v510_v28 = vpop.f32.mrf.mxu1 }
 0x1e7   :  { %v511_v29 = vadd.f32 %v627_v27, %v510_v28 }
 0x1e9   :  { %v513_v30 = vmax.f32 %v511_v29, 0.0 }
 0x1eb   :  { %550 = vmatmul.f32.vlgmr.msra.gmra.mxu2 %v513_v30 }
 0x26e   :  { %v551_v35 = vpop.f32.mrf.mxu2 }
 0x26f   :  { %v552_v36 = vadd.f32 %v628_v34, %v551_v35 }
 0x271   :  { %v554_v37 = vmax.f32 %v552_v36, 0.0 }
 0x273   :  { %591 = vmatmul.f32.vlgmr.msra.gmra.mxu3 %v554_v37 }
 0x2f6   :  { %v592_v39 = vpop.f32.mrf.mxu3 }
 0x2f7   :  { %v593_v40 = vadd.f32 %v629_v38, %v592_v39 }
 0x2f9   :  { %595 = vst [vmem:[#allocation13] sm:$0xff] %v593_v40 }
 0x2fa   :  { %606 = dma.vmem_to_hbm [thread:$0]  %s602_s5, 128, %s604_s14, [#allocation4]  }
 0x2fb   :  { %806 = dma.done.wait [#allocation4], 128  }
 0x2fc   :  { %807 = vsyncadd [#allocation4], 4294967168 }
 0x2fd   :  { %611 = vsyncpa [#allocation3], 1 }
 0x2fe   :  { %612 = vsyncpa [#allocation6], 1 }
 0x2ff   :  { %613 = vsyncpa [#allocation9], 1 }
 0x300   :  { %614 = vsyncpa [#allocation12], 1 }
 0x301   :  { %615 = vsyncpa [#allocation4], 1 }

</bundles_post_ra>
